<compile_context>
chip_gen: v5e
topology: v5e:2x2
jax: 0.10.0
libtpu: 0.0.40
codegen_flags: <defaults>
</compile_context>

<pallas_src>
import jax
import jax.numpy as jnp
import numpy as np
from jax.experimental import pallas as pl
from jax.experimental.pallas import tpu as pltpu


def channel_attention_kernel(x_ref, a1_ref, b1_ref, a2_ref, b2_ref, o_ref):
    x = x_ref[...]                              # (R_BLK, HW), I/O dtype
    xf = x.astype(jnp.float32)                  # internal math in f32

    # Global max / mean pooling over the spatial (lane) axis -> (R_BLK, 1).
    p_max = jnp.max(xf, axis=-1, keepdims=True)
    p_mean = jnp.mean(xf, axis=-1, keepdims=True)

    a1 = a1_ref[...]                            # (NB*Cr, R_BLK) = kron(I_NB, W1)
    b1 = b1_ref[...]                            # (NB*Cr, 1)
    a2 = a2_ref[...]                            # (R_BLK, NB*Cr) = kron(I_NB, W2)
    b2x2 = b2_ref[...]                          # (R_BLK, 1), pre-doubled (2*b2)

    # Shared MLP on both pooled vectors; per-sample mixing is handled by the
    # block-diagonal weights, so all NB samples run as one multi-row mat-vec.
    # mlp(max)+mlp(mean) = W2 @ (relu(W1 p_max + b1) + relu(W1 p_mean + b1)) + 2*b2
    h = (jnp.maximum(jnp.dot(a1, p_max, preferred_element_type=jnp.float32) + b1, 0.0)
         + jnp.maximum(jnp.dot(a1, p_mean, preferred_element_type=jnp.float32) + b1, 0.0))
    logits = jnp.dot(a2, h, preferred_element_type=jnp.float32) + b2x2   # (R_BLK, 1)

    attn = jax.nn.sigmoid(logits)               # exp lands on EUP (free slot)

    # Channel-wise scale: (R_BLK, HW) * (R_BLK, 1) broadcast over lanes.
    o_ref[...] = (xf * attn).astype(o_ref.dtype)


def _block_vmem_bytes(nb, C, Cr, HW, itemsize):
    """Rough VMEM footprint for one grid step with nb batch samples."""
    x_block = nb * C * HW * itemsize            # one in or out buffer
    f32_tmp = nb * C * HW * 4                   # in-kernel f32 working copy
    kron = 2 * (nb * Cr) * (nb * C) * 4         # a1 + a2
    bias = (nb * Cr + nb * C) * 128 * 4         # lane-padded bias columns
    # in+out double-buffered + (double-buffered) weights + temporaries
    return 2 * 2 * x_block + 2 * 2 * kron + 2 * bias + f32_tmp


def _pick_batches_per_block(N, C, Cr, HW, itemsize, budget_bytes):
    # Legal: nb divides N and the row block is a multiple of 8 sublanes
    # (or covers the whole row axis).
    legal = [nb for nb in range(1, N + 1)
             if N % nb == 0 and ((nb * C) % 8 == 0 or nb == N)]
    fitting = [nb for nb in legal
               if _block_vmem_bytes(nb, C, Cr, HW, itemsize) <= budget_bytes]
    if not fitting:
        # TODO(synk): for feature maps too large for VMEM even at nb=1, add a
        # two-phase variant (pooling pass over an 'arbitrary' HW grid axis,
        # then a scaling pass).
        return min(legal)
    # Prefer the largest block that still leaves >=2 grid steps (keeps the
    # pipeline double-buffered and lets v7x shard steps across its 2 TCs).
    multi_step = [nb for nb in fitting if N // nb >= 2]
    return max(multi_step) if multi_step else max(fitting)


def channel_attention(x_nchw, W1, b1, W2, b2, *, vmem_budget_bytes=24 * 1024 * 1024):
    """x_nchw: (N, C, H, W).  W1: (Cr, C), b1: (Cr,), W2: (C, Cr), b2: (C,)
    (torch nn.Linear layout).  Returns same shape/dtype as x_nchw."""
    N, C, H, W = x_nchw.shape
    HW = H * W
    Cr = W1.shape[0]
    itemsize = jnp.dtype(x_nchw.dtype).itemsize

    NB = _pick_batches_per_block(N, C, Cr, HW, itemsize, vmem_budget_bytes)
    R_BLK = NB * C

    # 2-D view: rows = batch*channel (sublane axis), cols = spatial (lane axis).
    x2d = x_nchw.reshape(N * C, HW)

    # Block-diagonal per-block MLP weights (f32 internal math), built once.
    eye = jnp.eye(NB, dtype=jnp.float32)
    a1 = jnp.kron(eye, W1.astype(jnp.float32))                       # (NB*Cr, NB*C)
    a2 = jnp.kron(eye, W2.astype(jnp.float32))                       # (NB*C, NB*Cr)
    b1_col = jnp.tile(b1.astype(jnp.float32), NB).reshape(NB * Cr, 1)
    b2x2_col = 2.0 * jnp.tile(b2.astype(jnp.float32), NB).reshape(NB * C, 1)

    needed = _block_vmem_bytes(NB, C, Cr, HW, itemsize) + 2 * 1024 * 1024
    vmem_limit = max(int(needed), 32 * 1024 * 1024)   # never below the defaults

    # Advisory cost hint: the op is HBM-bandwidth bound (read x once, write once).
    x_bytes = N * C * HW * itemsize
    w_bytes = (a1.size + a2.size + b1_col.size + b2x2_col.size) * 4
    cost = pl.CostEstimate(
        flops=3 * N * C * HW + 4 * N * (C * Cr + C),   # pool + scale + tiny MLP
        transcendentals=N * C,                          # sigmoid
        bytes_accessed=2 * x_bytes + w_bytes,
    )

    out2d = pl.pallas_call(
        channel_attention_kernel,
        out_shape=jax.ShapeDtypeStruct((N * C, HW), x_nchw.dtype),
        grid=(N // NB,),
        in_specs=[
            pl.BlockSpec((R_BLK, HW), lambda i: (i, 0)),        # x rows (lane-dense)
            pl.BlockSpec((NB * Cr, R_BLK), lambda i: (0, 0)),   # kron(I, W1), resident
            pl.BlockSpec((NB * Cr, 1), lambda i: (0, 0)),       # tiled b1
            pl.BlockSpec((R_BLK, NB * Cr), lambda i: (0, 0)),   # kron(I, W2), resident
            pl.BlockSpec((R_BLK, 1), lambda i: (0, 0)),         # tiled 2*b2
        ],
        out_specs=pl.BlockSpec((R_BLK, HW), lambda i: (i, 0)),
        compiler_params=pltpu.CompilerParams(
            dimension_semantics=("parallel",),
            vmem_limit_bytes=vmem_limit,
        ),
        cost_estimate=cost,
    )(x2d, a1, b1_col, a2, b2x2_col)

    return out2d.reshape(N, C, H, W)


def channel_attention_ref(x, W1, b1, W2, b2):
    """Plain-JAX reference mirroring the PyTorch forward."""
    N, C, _, _ = x.shape
    xf = x.reshape(N, C, -1).astype(jnp.float32)
    max_p = jnp.max(xf, axis=-1)     # (N, C)
    mean_p = jnp.mean(xf, axis=-1)   # (N, C)

    def mlp(p):
        h = jnp.maximum(p @ W1.T + b1, 0.0)
        return h @ W2.T + b2

    attn = jax.nn.sigmoid(mlp(max_p) + mlp(mean_p))   # (N, C)
    return (x.astype(jnp.float32) * attn[:, :, None, None]).astype(x.dtype)


def _run_case(key, N, C, H, W, reduction_ratio):
    Cr = C // reduction_ratio
    kx, k1, k2, k3, k4 = jax.random.split(key, 5)

    x = jax.random.normal(kx, (N, C, H, W), dtype=jnp.float32)
    # torch nn.Linear layout: W has shape (out_features, in_features).
    W1 = jax.random.normal(k1, (Cr, C), dtype=jnp.float32) * 0.5   # Linear(C -> Cr)
    b1 = jax.random.normal(k2, (Cr,), dtype=jnp.float32) * 0.1
    W2 = jax.random.normal(k3, (C, Cr), dtype=jnp.float32) * 0.5   # Linear(Cr -> C)
    b2 = jax.random.normal(k4, (C,), dtype=jnp.float32) * 0.1

    out = jax.block_until_ready(channel_attention(x, W1, b1, W2, b2))
    ref = channel_attention_ref(x, W1, b1, W2, b2)
    np.testing.assert_allclose(np.asarray(out), np.asarray(ref), rtol=1e-5, atol=1e-5)


if __name__ == "__main__":
    key = jax.random.PRNGKey(0)
    k_a, k_b = jax.random.split(key, 2)

    # Module config from the spec example: in_channels=4, reduction_ratio=2.
    _run_case(k_a, N=2, C=4, H=16, W=16, reduction_ratio=2)   # single grid step
    _run_case(k_b, N=8, C=4, H=32, W=32, reduction_ratio=2)   # multi-step pipelined grid

    print("KERNEL_OK")
</pallas_src>

<mosaic_0001>
module attributes {stable_mosaic.version = 11 : i64} {
  func.func @channel_attention_kernel(%arg0: i32, %arg1: memref<8x256xf32, #tpu.memory_space<vmem>>, %arg2: memref<4x8xf32, #tpu.memory_space<vmem>>, %arg3: memref<4x1xf32, #tpu.memory_space<vmem>>, %arg4: memref<8x4xf32, #tpu.memory_space<vmem>>, %arg5: memref<8x1xf32, #tpu.memory_space<vmem>>, %arg6: memref<8x256xf32, #tpu.memory_space<vmem>>) attributes {dimension_semantics = [#tpu.dimension_semantics<parallel>], iteration_bounds = array<i64: 1>, scalar_prefetch = 0 : i64, scratch_operands = 0 : i64, tpu.core_type = #tpu.core_type<tc>, window_params = [{transform_indices = @transform_0, window_bounds = array<i64: 8, 256>}, {pipeline_mode = #tpu.pipeline_mode<synchronous>, transform_indices = @transform_1, window_bounds = array<i64: 4, 8>}, {pipeline_mode = #tpu.pipeline_mode<synchronous>, transform_indices = @transform_2, window_bounds = array<i64: 4, 1>}, {pipeline_mode = #tpu.pipeline_mode<synchronous>, transform_indices = @transform_3, window_bounds = array<i64: 8, 4>}, {pipeline_mode = #tpu.pipeline_mode<synchronous>, transform_indices = @transform_4, window_bounds = array<i64: 8, 1>}, {transform_indices = @transform_5, window_bounds = array<i64: 8, 256>}]} {
    %c0 = arith.constant 0 : index
    %c0_0 = arith.constant 0 : index
    %0 = vector.load %arg1[%c0, %c0_0] : memref<8x256xf32, #tpu.memory_space<vmem>>, vector<8x256xf32>
    %cst = arith.constant dense<0xFF800000> : vector<8xf32>
    %1 = vector.multi_reduction <maximumf>, %0, %cst [1] : vector<8x256xf32> to vector<8xf32>
    %2 = vector.shape_cast %1 : vector<8xf32> to vector<8x1xf32>
    %cst_1 = arith.constant dense<0.000000e+00> : vector<8xf32>
    %3 = vector.multi_reduction <add>, %0, %cst_1 [1] : vector<8x256xf32> to vector<8xf32>
    %4 = vector.shape_cast %3 : vector<8xf32> to vector<8x1xf32>
    %cst_2 = arith.constant 2.560000e+02 : f32
    %5 = vector.broadcast %cst_2 : f32 to vector<8x1xf32>
    %6 = arith.divf %4, %5 : vector<8x1xf32>
    %c0_3 = arith.constant 0 : index
    %c0_4 = arith.constant 0 : index
    %7 = vector.load %arg2[%c0_3, %c0_4] : memref<4x8xf32, #tpu.memory_space<vmem>>, vector<4x8xf32>
    %c0_5 = arith.constant 0 : index
    %c0_6 = arith.constant 0 : index
    %8 = vector.load %arg3[%c0_5, %c0_6] : memref<4x1xf32, #tpu.memory_space<vmem>>, vector<4x1xf32>
    %c0_7 = arith.constant 0 : index
    %c0_8 = arith.constant 0 : index
    %9 = vector.load %arg4[%c0_7, %c0_8] : memref<8x4xf32, #tpu.memory_space<vmem>>, vector<8x4xf32>
    %c0_9 = arith.constant 0 : index
    %c0_10 = arith.constant 0 : index
    %10 = vector.load %arg5[%c0_9, %c0_10] : memref<8x1xf32, #tpu.memory_space<vmem>>, vector<8x1xf32>
    %cst_11 = arith.constant dense<0.000000e+00> : vector<4x1xf32>
    %11 = tpu.matmul %7, %2, %cst_11 {dimension_numbers = #tpu.dot_dimension_numbers<[1], [0], [0], [1], [0, 0, 1, 1], [], []>} : vector<4x8xf32>, vector<8x1xf32>, vector<4x1xf32> -> vector<4x1xf32>
    %12 = arith.addf %11, %8 : vector<4x1xf32>
    %cst_12 = arith.constant 0.000000e+00 : f32
    %13 = vector.broadcast %cst_12 : f32 to vector<4x1xf32>
    %14 = arith.maximumf %12, %13 : vector<4x1xf32>
    %cst_13 = arith.constant dense<0.000000e+00> : vector<4x1xf32>
    %15 = tpu.matmul %7, %6, %cst_13 {dimension_numbers = #tpu.dot_dimension_numbers<[1], [0], [0], [1], [0, 0, 1, 1], [], []>} : vector<4x8xf32>, vector<8x1xf32>, vector<4x1xf32> -> vector<4x1xf32>
    %16 = arith.addf %15, %8 : vector<4x1xf32>
    %cst_14 = arith.constant 0.000000e+00 : f32
    %17 = vector.broadcast %cst_14 : f32 to vector<4x1xf32>
    %18 = arith.maximumf %16, %17 : vector<4x1xf32>
    %19 = arith.addf %14, %18 : vector<4x1xf32>
    %cst_15 = arith.constant dense<0.000000e+00> : vector<8x1xf32>
    %20 = tpu.matmul %9, %19, %cst_15 {dimension_numbers = #tpu.dot_dimension_numbers<[1], [0], [0], [1], [0, 0, 1, 1], [], []>} : vector<8x4xf32>, vector<4x1xf32>, vector<8x1xf32> -> vector<8x1xf32>
    %21 = arith.addf %20, %10 : vector<8x1xf32>
    %22 = arith.negf %21 : vector<8x1xf32>
    %23 = math.exp %22 : vector<8x1xf32>
    %cst_16 = arith.constant 1.000000e+00 : f32
    %24 = vector.broadcast %cst_16 : f32 to vector<8x1xf32>
    %25 = arith.addf %24, %23 : vector<8x1xf32>
    %26 = arith.divf %24, %25 : vector<8x1xf32>
    %27 = vector.broadcast %26 : vector<8x1xf32> to vector<8x256xf32>
    %28 = arith.mulf %0, %27 : vector<8x256xf32>
    %c0_17 = arith.constant 0 : index
    %c0_18 = arith.constant 0 : index
    %29 = vector.load %arg6[%c0_17, %c0_18] : memref<8x256xf32, #tpu.memory_space<vmem>>, vector<8x256xf32>
    tpu.vector_store %arg6[%c0_17, %c0_18], %28 {strides = array<i32>} : memref<8x256xf32, #tpu.memory_space<vmem>>, vector<8x256xf32>,
    return
  }
  func.func @transform_0(%arg0: i32) -> (i32, i32) {
    %c0_i32 = arith.constant 0 : i32
    %c0_i32_0 = arith.constant 0 : i32
    return %arg0, %c0_i32 : i32, i32
  }
  func.func @transform_1(%arg0: i32) -> (i32, i32) {
    %c0_i32 = arith.constant 0 : i32
    %c0_i32_0 = arith.constant 0 : i32
    %c0_i32_1 = arith.constant 0 : i32
    return %c0_i32, %c0_i32_0 : i32, i32
  }
  func.func @transform_2(%arg0: i32) -> (i32, i32) {
    %c0_i32 = arith.constant 0 : i32
    %c0_i32_0 = arith.constant 0 : i32
    %c0_i32_1 = arith.constant 0 : i32
    return %c0_i32, %c0_i32_0 : i32, i32
  }
  func.func @transform_3(%arg0: i32) -> (i32, i32) {
    %c0_i32 = arith.constant 0 : i32
    %c0_i32_0 = arith.constant 0 : i32
    %c0_i32_1 = arith.constant 0 : i32
    return %c0_i32, %c0_i32_0 : i32, i32
  }
  func.func @transform_4(%arg0: i32) -> (i32, i32) {
    %c0_i32 = arith.constant 0 : i32
    %c0_i32_0 = arith.constant 0 : i32
    %c0_i32_1 = arith.constant 0 : i32
    return %c0_i32, %c0_i32_0 : i32, i32
  }
  func.func @transform_5(%arg0: i32) -> (i32, i32) {
    %c0_i32 = arith.constant 0 : i32
    %c0_i32_0 = arith.constant 0 : i32
    return %arg0, %c0_i32 : i32, i32
  }
}

</mosaic_0001>

<bundles_post_ra>
// kernel: tpu_custom_call.1
= control target key start
LH: loop header
LB: loop body
LE: loop exit
PB: predicated region body
PF: predicated region fallthrough
CT: control target
= control target key end

     0   :  { %s266_s0 = inlined_call_operand.vmem [shape: f32[8,256], index: 0, kind: input, shape index: {}]   ;;  %s267_s1 = inlined_call_operand.vmem [shape: f32[4,8], index: 1, kind: input, shape index: {}]   ;;  %s268_s2 = inlined_call_operand.vmem [shape: f32[4,1], index: 2, kind: input, shape index: {}]   ;;  %s269_s3 = inlined_call_operand.vmem [shape: f32[8,4], index: 3, kind: input, shape index: {}]   ;;  %s270_s4 = inlined_call_operand.vmem [shape: f32[8,1], index: 4, kind: input, shape index: {}]   ;;  %s271_s5 = inlined_call_operand.hbm [shape: f32[8,256], index: 5, kind: output, shape index: {}]  }
   0x1   :  { %v238_v0 = vld [vmem:[%s266_s0] sm:$0xff]  ;;  %v243_v1 = vld [vmem:[%s266_s0 + $0x8] sm:$0xff] }
   0x2   :  { %10 = vsyncpa [#allocation3], 0  ;;  %v26_v2 = vadd.f32 %v243_v1, %v238_v0  ;;  %v23_v3 = vmax.f32 %v238_v0, %v243_v1  ;;  %v202_v4 = vmov 256.0   ;;  %v37_v13 = vld [vmem:[%s267_s1] sm:$0xf]  ;;  %vm41_vm1 = vcmask 64512  }
   0x3   :  { %170 = vrcp.f32 %v202_v4  ;;  %v38_v15 = vld [vmem:[%s268_s2] sm:$0xf]  ;;  %vm92_vm2 = vcmask 1043456   ;;  %vm88_vm3 = vcmask 31744   ;;  %v203_v24 = vmov 0   ;;  %s151_s29 = sshll.u32 %s271_s5, 4  ;;  %s152_s29 = int_to_ptr.hbm [resolvable:$true] %s151_s29 }
   0x4   :  { %27 = vadd.xlane.f32.xlu0 %v26_v2  ;;  %v39_v23 = vld [vmem:[%s269_s3] sm:$0xff]  ;;  %168 = vset.pattern.permute.xlu1 %v203_v24  ;;  %s204_s3 = smov [#allocation2]  }
   0x5   :  { %169 = vset.pattern.permute.xlu0 %v203_v24  ;;  %v40_v25 = vld [vmem:[%s270_s4] sm:$0xff]  ;;  %s149_s4 = sshll.u32 %s204_s3, 4  ;;  %s150_s4 = int_to_ptr.vmem [resolvable:$true] %s149_s4 }
   0x9   :  { %v171_v5 = vpop.eup %170 }
   0xa   :  { %v30_v6 = vmul.f32 256.0, %v171_v5  ;;  %vm34_vm0 = vweird.f32 %v171_v5 }
   0xc   :  { %24 = vmax.xlane.f32.xlu0 %v23_v3  ;;  %v31_v7 = vsub.f32 1.0, %v30_v6 }
   0xe   :  { %v32_v8 = vmul.f32 %v171_v5, %v31_v7 }
  0x10   :  { %v33_v9 = vadd.f32 %v171_v5, %v32_v8 }
  0x12   :  { %v35_v10 = vsel %vm34_vm0, %v171_v5, %v33_v9 }
  0x77   :  { %v28_v11 = vpop.xlane.xlu0 %27 }
  0x78   :  { %v36_v12 = vmul.f32 %v35_v10, %v28_v11 }
  0x7a   :  { %81 = vmatpush.msra.mxu1 %v36_v12 }
  0x7b   :  { %161 = vmatmul.msk.f32.vlgmr.msra.gmra.mxu1 %vm41_vm1, %v37_v13 }
  0x7f   :  { %v25_v14 = vpop.xlane.xlu0 %24 }
  0x80   :  { %60 = vmatpush.msra.mxu0 %v25_v14 }
  0x81   :  { %160 = vmatmul.msk.f32.vlgmr.msra.gmra.mxu0 %vm41_vm1, %v37_v13 }
  0xf8   :  { %v83_v16 = vpop.f32.mrf.mxu1 }
  0xf9   :  { %v84_v17 = vadd.f32 %v83_v16, %v38_v15 }
  0xfb   :  { %v86_v20 = vmax.f32 %v84_v17, 0.0 }
  0xfe   :  { %v62_v18 = vpop.f32.mrf.mxu0 }
  0xff   :  { %v63_v19 = vadd.f32 %v62_v18, %v38_v15 }
 0x101   :  { %v65_v21 = vmax.f32 %v63_v19, 0.0 }
 0x103   :  { %v87_v22 = vadd.f32 %v86_v20, %v65_v21 }
 0x105   :  { %162 = vmatpush.msk.msra.mxu2 %vm92_vm2, %v87_v22 }
 0x106   :  { %163 = vmatmul.msk.f32.vlgmr.msra.gmra.mxu2 %vm88_vm3, %v39_v23 }
 0x189   :  { %v113_v26 = vpop.f32.mrf.mxu2 }
 0x18a   :  { %v114_v27 = vadd.f32 %v113_v26, %v40_v25 }
 0x18c   :  { %v164_v28 = vmul.f32 -1.442695, %v114_v27 }
 0x18e   :  { %172 = vpow2.f32 %v164_v28 }
 0x194   :  { %v173_v29 = vpop.eup %172 }
 0x195   :  { %v119_v30 = vadd.f32 1.0, %v173_v29 }
 0x197   :  { %174 = vrcp.f32 %v119_v30  ;;  %v131_v34 = vand.u32 2147483648, %v119_v30  ;;  %v129_v36 = vand.u32 2147483647, %v119_v30  ;;  %vm125_vm5 = vweird.f32 %v119_v30 }
 0x199   :  { %v132_v38 = vor.u32 1.1754944e-38, %v131_v34  ;;  %vm130_vm7 = vcmp.eq.f32.partialorder %v129_v36, 8.507059e+37 }
 0x19d   :  { %v175_v31 = vpop.eup %174 }
 0x19e   :  { %v121_v32 = vmul.f32 %v175_v31, %v119_v30  ;;  %vm126_vm4 = vweird.f32 %v175_v31 }
 0x19f   :  { %vm127_vm6 = vmor %vm125_vm5, %vm126_vm4 }
 0x1a0   :  { %v122_v33 = vsub.f32 1.0, %v121_v32 }
 0x1a2   :  { %v123_v35 = vmul.f32 %v175_v31, %v122_v33 }
 0x1a4   :  { %v124_v37 = vadd.f32 %v175_v31, %v123_v35 }
 0x1a6   :  { %v128_v39 = vsel %vm127_vm6, %v175_v31, %v124_v37 }
 0x1a7   :  { %v133_v40 = vsel %vm130_vm7, %v132_v38, %v128_v39 }
 0x1a8   :  { %137 = vperm.xlu1 %168, %v133_v40  }
 0x21a   :  { %v138_v41 = vpop.permute.xlu1 %137 }
 0x21b   :  { %v140_v42 = vmul.f32 %v138_v41, %v238_v0  ;;  %v141_v43 = vmul.f32 %v138_v41, %v243_v1 }
 0x21d   :  { %142 = vst [vmem:[#allocation2] sm:$0xff] %v140_v42 }
 0x21e   :  { %143 = vst [vmem:[#allocation2 + $0x8] sm:$0xff] %v141_v43 }
 0x21f   :  { %154 = dma.vmem_to_hbm [thread:$0]  %s150_s4, 256, %s152_s29, [#allocation3]  }
 0x220   :  { %200 = dma.done.wait [#allocation3], 256  }
 0x221   :  { %201 = vsyncadd [#allocation3], 4294967040 }
 0x222   :  { %159 = vsyncpa [#allocation3], 1 }

</bundles_post_ra>
